<compile_context>
chip_gen: v7x
topology: tpu7x:2x2x1
jax: 0.10.0
libtpu: 0.0.40
codegen_flags: <defaults>
</compile_context>

<pallas_src>
import jax
import jax.numpy as jnp
from jax import lax
from jax.experimental import pallas as pl
from jax.experimental.pallas import tpu as pltpu


def _round_up(x, m):
    return ((x + m - 1) // m) * m


def _affine_kernel(x_ref, w_ref, o_ref, acc_ref):
    # grid = (j over N tiles, i over M tiles, k over K tiles); K is last.
    @pl.when(pl.program_id(2) == 0)
    def _():
        acc_ref[...] = jnp.zeros_like(acc_ref)

    # x tile: (tm, tk); w tile: (tn, tk) in native nn.Linear layout.
    # Contract the K dim of both -> (tm, tn), accumulated in f32 on the MXU.
    # TODO(synk): optionally cast tiles to bf16 here (keeping f32 acc) for
    # ~2x MXU throughput / half the weight HBM bytes on v6e/v7x.
    acc_ref[...] += lax.dot_general(
        x_ref[...],
        w_ref[...],
        dimension_numbers=(((1,), (1,)), ((), ())),
        preferred_element_type=jnp.float32,
    )

    @pl.when(pl.program_id(2) == pl.num_programs(2) - 1)
    def _():
        o_ref[...] = acc_ref[...].astype(o_ref.dtype)


def affine_forward(x, weight, *, tm=256, tn=256, tk=2048):
    """out = x @ weight.T  (torch nn.Linear forward, bias=False).

    x:      (M, K) = (batch, inp_dim)
    weight: (N, K) = (out_dim, inp_dim)   -- native nn.Linear layout.
    """
    M, K = x.shape
    N, K2 = weight.shape
    assert K == K2, "inp_dim mismatch between x and weight"

    # Clamp tile sizes to the (padded) problem, keeping hardware alignment:
    # sublane dim multiple of 8, lane dim multiple of 128 (lane-dense output).
    tm = min(tm, _round_up(M, 8))
    tn = min(tn, _round_up(N, 128))
    tk = min(tk, _round_up(K, 128))

    Mp, Np, Kp = _round_up(M, tm), _round_up(N, tn), _round_up(K, tk)

    # Zero-pad (glue JAX): K padding contributes 0 to the dot product; M/N
    # padding is sliced off below. Replaces the hard divisibility asserts.
    x_p = x if (Mp, Kp) == (M, K) else jnp.pad(x, ((0, Mp - M), (0, Kp - K)))
    w_p = (
        weight
        if (Np, Kp) == (N, K)
        else jnp.pad(weight, ((0, Np - N), (0, Kp - K)))
    )

    grid = (Np // tn, Mp // tm, Kp // tk)
    itemsize = jnp.dtype(x.dtype).itemsize

    out_p = pl.pallas_call(
        _affine_kernel,
        out_shape=jax.ShapeDtypeStruct((Mp, Np), x.dtype),
        grid_spec=pltpu.PrefetchScalarGridSpec(
            num_scalar_prefetch=0,
            grid=grid,
            in_specs=[
                # x tile: re-read only Np // tn times total (once per j).
                pl.BlockSpec((tm, tk), lambda j, i, k: (i, k)),
                # weight tile, native (N, K) layout. With j outermost and a
                # single K step (the common case for this head), the block
                # index is constant across the whole inner M loop, so the
                # weight is fetched once and stays VMEM-resident.
                pl.BlockSpec((tn, tk), lambda j, i, k: (j, k)),
            ],
            out_specs=pl.BlockSpec((tm, tn), lambda j, i, k: (i, j)),
            scratch_shapes=[pltpu.VMEM((tm, tn), jnp.float32)],
        ),
        compiler_params=pltpu.CompilerParams(
            dimension_semantics=("parallel", "parallel", "arbitrary"),
        ),
        cost_estimate=pl.CostEstimate(
            flops=2 * Mp * Np * Kp,
            transcendentals=0,
            bytes_accessed=(Mp * Kp + Np * Kp + Mp * Np) * itemsize,
        ),
    )(x_p, w_p)

    return out_p[:M, :N]


if __name__ == "__main__":
    # Small shapes consistent with Affine(inp_dim, out_dim=1):
    batch, inp_dim, out_dim = 8, 512, 1

    key = jax.random.PRNGKey(0)
    kx, kw = jax.random.split(key)

    x = jax.random.normal(kx, (batch, inp_dim), dtype=jnp.float32)
    # Deterministic init mimicking nn.Linear default (uniform +/- 1/sqrt(inp_dim)).
    bound = 1.0 / (inp_dim ** 0.5)
    weight = jax.random.uniform(
        kw, (out_dim, inp_dim), dtype=jnp.float32, minval=-bound, maxval=bound
    )

    out = affine_forward(x, weight)
    out = jax.block_until_ready(out)

    # Correctness check against plain-JAX reference of nn.Linear(bias=False).
    ref = x @ weight.T
    assert out.shape == (batch, out_dim)
    assert jnp.allclose(out, ref, atol=1e-5, rtol=1e-5)

    print("KERNEL_OK")
</pallas_src>

<mosaic_0001>
module attributes {stable_mosaic.version = 11 : i64} {
  func.func @_affine_kernel(%arg0: i32, %arg1: i32, %arg2: i32, %arg3: memref<8x512xf32, #tpu.memory_space<vmem>>, %arg4: memref<128x512xf32, #tpu.memory_space<vmem>>, %arg5: memref<8x128xf32, #tpu.memory_space<vmem>>, %arg6: memref<8x128xf32, #tpu.memory_space<vmem>>) attributes {dimension_semantics = [#tpu.dimension_semantics<parallel>, #tpu.dimension_semantics<parallel>, #tpu.dimension_semantics<arbitrary>], iteration_bounds = array<i64: 1, 1, 1>, scalar_prefetch = 0 : i64, scratch_operands = 1 : i64, tpu.core_type = #tpu.core_type<tc>, window_params = [{transform_indices = @transform_0, window_bounds = array<i64: 8, 512>}, {transform_indices = @transform_1, window_bounds = array<i64: 128, 512>}, {transform_indices = @transform_2, window_bounds = array<i64: 8, 128>}]} {
    %c0_i32 = arith.constant 0 : i32
    %0 = arith.cmpi eq, %arg2, %c0_i32 : i32
    %1 = arith.extui %0 : i1 to i32
    %c0_i32_0 = arith.constant 0 : i32
    %2 = arith.cmpi ne, %1, %c0_i32_0 : i32
    scf.if %2 {
      %cst_10 = arith.constant 0.000000e+00 : f32
      %12 = vector.broadcast %cst_10 : f32 to vector<8x128xf32>
      %c0_11 = arith.constant 0 : index
      %c0_12 = arith.constant 0 : index
      %13 = vector.load %arg6[%c0_11, %c0_12] : memref<8x128xf32, #tpu.memory_space<vmem>>, vector<8x128xf32>
      tpu.vector_store %arg6[%c0_11, %c0_12], %12 {strides = array<i32>} : memref<8x128xf32, #tpu.memory_space<vmem>>, vector<8x128xf32>,
    } else {
    }
    %c0 = arith.constant 0 : index
    %c0_1 = arith.constant 0 : index
    %3 = vector.load %arg6[%c0, %c0_1] : memref<8x128xf32, #tpu.memory_space<vmem>>, vector<8x128xf32>
    %c0_2 = arith.constant 0 : index
    %c0_3 = arith.constant 0 : index
    %4 = vector.load %arg3[%c0_2, %c0_3] : memref<8x512xf32, #tpu.memory_space<vmem>>, vector<8x512xf32>
    %c0_4 = arith.constant 0 : index
    %c0_5 = arith.constant 0 : index
    %5 = vector.load %arg4[%c0_4, %c0_5] : memref<128x512xf32, #tpu.memory_space<vmem>>, vector<128x512xf32>
    %cst = arith.constant dense<0.000000e+00> : vector<8x128xf32>
    %6 = tpu.matmul %4, %5, %cst {dimension_numbers = #tpu.dot_dimension_numbers<[1], [1], [0], [0], [0, 0, 1, 0], [], []>} : vector<8x512xf32>, vector<128x512xf32>, vector<8x128xf32> -> vector<8x128xf32>
    %7 = arith.addf %3, %6 : vector<8x128xf32>
    %c0_6 = arith.constant 0 : index
    %c0_7 = arith.constant 0 : index
    %8 = vector.load %arg6[%c0_6, %c0_7] : memref<8x128xf32, #tpu.memory_space<vmem>>, vector<8x128xf32>
    tpu.vector_store %arg6[%c0_6, %c0_7], %7 {strides = array<i32>} : memref<8x128xf32, #tpu.memory_space<vmem>>, vector<8x128xf32>,
    %c0_i32_8 = arith.constant 0 : i32
    %9 = arith.cmpi eq, %arg2, %c0_i32_8 : i32
    %10 = arith.extui %9 : i1 to i32
    %c0_i32_9 = arith.constant 0 : i32
    %11 = arith.cmpi ne, %10, %c0_i32_9 : i32
    scf.if %11 {
      %c0_10 = arith.constant 0 : index
      %c0_11 = arith.constant 0 : index
      %12 = vector.load %arg6[%c0_10, %c0_11] : memref<8x128xf32, #tpu.memory_space<vmem>>, vector<8x128xf32>
      %c0_12 = arith.constant 0 : index
      %c0_13 = arith.constant 0 : index
      %13 = vector.load %arg5[%c0_12, %c0_13] : memref<8x128xf32, #tpu.memory_space<vmem>>, vector<8x128xf32>
      tpu.vector_store %arg5[%c0_12, %c0_13], %12 {strides = array<i32>} : memref<8x128xf32, #tpu.memory_space<vmem>>, vector<8x128xf32>,
    } else {
    }
    return
  }
  func.func @transform_0(%arg0: i32, %arg1: i32, %arg2: i32) -> (i32, i32) {
    %c0_i32 = arith.constant 0 : i32
    return %arg1, %arg2 : i32, i32
  }
  func.func @transform_1(%arg0: i32, %arg1: i32, %arg2: i32) -> (i32, i32) {
    %c0_i32 = arith.constant 0 : i32
    return %arg0, %arg2 : i32, i32
  }
  func.func @transform_2(%arg0: i32, %arg1: i32, %arg2: i32) -> (i32, i32) {
    %c0_i32 = arith.constant 0 : i32
    return %arg1, %arg0 : i32, i32
  }
}

</mosaic_0001>

<bundles_post_ra>
// kernel: tpu_custom_call.1
= control target key start
LH: loop header
LB: loop body
LE: loop exit
PB: predicated region body
PF: predicated region fallthrough
CT: control target
= control target key end

     0   :  { %7 = vsyncpa [#allocation4], 0  ;;  %s480_s0 = inlined_call_operand.hbm [shape: f32[8,512], index: 0, kind: input, shape index: {}]   ;;  %s481_s1 = inlined_call_operand.hbm [shape: f32[128,512], index: 1, kind: input, shape index: {}]   ;;  %s482_s2 = inlined_call_operand.hbm [shape: f32[8,128], index: 2, kind: output, shape index: {}]  }
   0x1   :  { %8 = vsyncpa [#allocation7], 0 }
   0x2   :  { %9 = vsyncpa [#allocation5], 0  ;;  %s417_s9 = smov [#allocation3]   ;;  %s418_s11 = smov [#allocation6]  }
   0x3   :  { %s16_s10 = sshll.u32 %s417_s9, 4  ;;  %s25_s12 = sshll.u32 %s418_s11, 4  ;;  %s17_s10 = int_to_ptr.vmem [resolvable:$true] %s16_s10  ;;  %s437_s12 = int_to_ptr.vmem [resolvable:$true] %s25_s12 }
   0x4   :  { %s345_s15 = scalar_lea.hbm %s480_s0, 512 }
   0x5   :  { %p346_p0 = scmp.ne.s32.totalorder %s480_s0, %s345_s15  ;;  %p349_p1 = scmp.lt.u32.totalorder %s345_s15, %s480_s0 }
   0x7   :  { %p351_p2 = pnand %p349_p1, %p346_p0 }
   0x9   :  { %354 = shalt.err (!%p351_p2)
}
   0xa   :  { %s355_s20 = scalar_lea.vmem %s17_s10, 512  ;;  %p360_p4 = scmp.lt.s32.totalorder %s17_s10, %s17_s10 }
   0xb   :  { %p356_p3 = scmp.ne.s32.totalorder %s17_s10, %s355_s20  ;;  %p361_p5 = scmp.lt.s32.totalorder %s355_s20, %s355_s20 }
   0xd   :  { %p362_p6 = por %p361_p5, %p360_p4 }
   0xf   :  { %p363_p7 = pnand %p362_p6, %p356_p3 }
  0x11   :  { %366 = shalt.err (!%p363_p7)
}
  0x12   :  { %19 = dma.hbm_to_vmem [thread:$0]  %s480_s0, 512, %s17_s10, [#allocation4]  }
  0x13   :  { %s367_s25 = scalar_lea.hbm %s481_s1, 8192 }
  0x14   :  { %p368_p8 = scmp.ne.s32.totalorder %s481_s1, %s367_s25  ;;  %p371_p9 = scmp.lt.u32.totalorder %s367_s25, %s481_s1 }
  0x16   :  { %p373_p10 = pnand %p371_p9, %p368_p8 }
  0x18   :  { %376 = shalt.err (!%p373_p10)
}
  0x19   :  { %s377_s30 = scalar_lea.vmem %s437_s12, 8192  ;;  %p382_p12 = scmp.lt.s32.totalorder %s437_s12, %s437_s12 }
  0x1a   :  { %p378_p11 = scmp.ne.s32.totalorder %s437_s12, %s377_s30  ;;  %p383_p13 = scmp.lt.s32.totalorder %s377_s30, %s377_s30 }
  0x1c   :  { %p384_p0 = por %p383_p13, %p382_p12 }
  0x1e   :  { %p385_p1 = pnand %p384_p0, %p378_p11 }
  0x20   :  { %388 = shalt.err (!%p385_p1)
}
  0x21   :  { %s419_s0 = smov 512   ;;  %s420_s3 = smov 32  }
  0x22   :  { %31 = dma.hbm_to_vmem [thread:$0]  %s481_s1, 8192, %s437_s12, [#allocation7], %s419_s0, %s419_s0, %s420_s3  }
  0x23   :  { %411 = dma.done.wait [#allocation4], 512  }
  0x24   :  { %412 = vsyncadd [#allocation4], 4294966784 }
  0x25   :  { %413 = dma.done.wait [#allocation7], 8192  }
  0x26   :  { %414 = vsyncadd [#allocation7], 4294959104  ;;  %v49_v0 = vld [vmem:[#allocation6 + $0x8] sm:$0xff]  ;;  %v51_v2 = vld [vmem:[#allocation6 + $0x18] sm:$0xff]  ;;  %s421_s1 = smov [#allocation8]  }
  0x27   :  { %v53_v1 = vld [vmem:[#allocation6 + $0x28] sm:$0xff]  ;;  %v55_v4 = vld [vmem:[#allocation6 + $0x38] sm:$0xff]  ;;  %v48_v5 = vld [vmem:[#allocation6] sm:$0xff]  ;;  %s265_s6 = sshll.u32 %s421_s1, 4  ;;  %s266_s6 = int_to_ptr.vmem [resolvable:$true] %s265_s6 }
  0x28   :  { %v275_v3 = vpack.c.bf16 %v53_v1, %v49_v0  ;;  %v52_v6 = vld [vmem:[#allocation6 + $0x20] sm:$0xff]  ;;  %v307_v7 = vpack.c.bf16 %v55_v4, %v51_v2  ;;  %v50_v9 = vld [vmem:[#allocation6 + $0x10] sm:$0xff]  ;;  %v57_v11 = vld [vmem:[#allocation6 + $0x48] sm:$0xff]  ;;  %s389_s7 = scalar_lea.vmem %s266_s6, 128  ;;  %p394_p3 = scmp.lt.s32.totalorder %s266_s6, %s266_s6 }
  0x29   :  { %v277_v8 = vpack.c.bf16 %v52_v6, %v48_v5  ;;  %v54_v10 = vld [vmem:[#allocation6 + $0x30] sm:$0xff]  ;;  %v61_v13 = vld [vmem:[#allocation6 + $0x68] sm:$0xff]  ;;  %v59_v14 = vld [vmem:[#allocation6 + $0x58] sm:$0xff]  ;;  %p390_p2 = scmp.ne.s32.totalorder %s266_s6, %s389_s7  ;;  %p395_p4 = scmp.lt.s32.totalorder %s389_s7, %s389_s7 }
  0x2a   :  { %276 = vmatprep.subr.bf16.mxu1 %v275_v3  ;;  %v309_v12 = vpack.c.bf16 %v54_v10, %v50_v9  ;;  %v63_v15 = vld [vmem:[#allocation6 + $0x78] sm:$0xff]  ;;  %308 = vmatprep.subr.bf16.mxu0 %v307_v7  ;;  %v279_v16 = vpack.c.bf16 %v61_v13, %v57_v11  ;;  %v56_v18 = vld [vmem:[#allocation6 + $0x40] sm:$0xff]  ;;  %v58_v20 = vld [vmem:[#allocation6 + $0x50] sm:$0xff] }
  0x2b   :  { %278 = vmatpush1.bf16.xpose.msra.mxu1 %v277_v8  ;;  %v311_v17 = vpack.c.bf16 %v63_v15, %v59_v14  ;;  %v60_v19 = vld [vmem:[#allocation6 + $0x60] sm:$0xff]  ;;  %v62_v21 = vld [vmem:[#allocation6 + $0x70] sm:$0xff]  ;;  %v65_v22 = vld [vmem:[#allocation6 + $0x88] sm:$0xff]  ;;  %p396_p5 = por %p395_p4, %p394_p3 }
  0x2c   :  { %310 = vmatpush1.bf16.xpose.msra.mxu0 %v309_v12  ;;  %280 = vmatprep.subr.bf16.mxu1 %v279_v16  ;;  %v69_v23 = vld [vmem:[#allocation6 + $0xa8] sm:$0xff]  ;;  %v67_v24 = vld [vmem:[#allocation6 + $0x98] sm:$0xff]  ;;  %v281_v26 = vpack.c.bf16 %v60_v19, %v56_v18  ;;  %v313_v27 = vpack.c.bf16 %v62_v21, %v58_v20  ;;  %v64_v30 = vld [vmem:[#allocation6 + $0x80] sm:$0xff] }
  0x2d   :  { %312 = vmatprep.subr.bf16.mxu0 %v311_v17  ;;  %v71_v25 = vld [vmem:[#allocation6 + $0xb8] sm:$0xff]  ;;  %v283_v28 = vpack.c.bf16 %v69_v23, %v65_v22  ;;  %v68_v31 = vld [vmem:[#allocation6 + $0xa0] sm:$0xff]  ;;  %v66_v32 = vld [vmem:[#allocation6 + $0x90] sm:$0xff]  ;;  %p397_p6 = pnand %p396_p5, %p390_p2 }
  0x2e   :  { %v315_v29 = vpack.c.bf16 %v71_v25, %v67_v24  ;;  %v70_v33 = vld [vmem:[#allocation6 + $0xb0] sm:$0xff]  ;;  %v73_v34 = vld [vmem:[#allocation6 + $0xc8] sm:$0xff]  ;;  %v75_v36 = vld [vmem:[#allocation6 + $0xd8] sm:$0xff]  ;;  %v285_v38 = vpack.c.bf16 %v68_v31, %v64_v30 }
  0x2f   :  { %v77_v35 = vld [vmem:[#allocation6 + $0xe8] sm:$0xff]  ;;  %v79_v37 = vld [vmem:[#allocation6 + $0xf8] sm:$0xff]  ;;  %v317_v39 = vpack.c.bf16 %v70_v33, %v66_v32  ;;  %v72_v42 = vld [vmem:[#allocation6 + $0xc0] sm:$0xff] }
  0x30   :  { %v287_v40 = vpack.c.bf16 %v77_v35, %v73_v34  ;;  %v319_v41 = vpack.c.bf16 %v79_v37, %v75_v36  ;;  %v76_v43 = vld [vmem:[#allocation6 + $0xe0] sm:$0xff]  ;;  %v74_v44 = vld [vmem:[#allocation6 + $0xd0] sm:$0xff]  ;;  %v45_v45 = vld [vmem:[#allocation3 + $0x8] sm:$0xff] }
  0x31   :  { %v47_v46 = vld [vmem:[#allocation3 + $0x18] sm:$0xff]  ;;  %v78_v47 = vld [vmem:[#allocation6 + $0xf0] sm:$0xff]  ;;  %v81_v48 = vld [vmem:[#allocation6 + $0x108] sm:$0xff]  ;;  %176 = vmatprep.mubr.f32.mxu1 %v45_v45  ;;  %v289_v52 = vpack.c.bf16 %v76_v43, %v72_v42 }
  0x32   :  { %v85_v49 = vld [vmem:[#allocation6 + $0x128] sm:$0xff]  ;;  %v83_v50 = vld [vmem:[#allocation6 + $0x118] sm:$0xff]  ;;  %246 = vmatprep.mubr.f32.mxu0 %v47_v46  ;;  %v321_v53 = vpack.c.bf16 %v78_v47, %v74_v44  ;;  %v80_v56 = vld [vmem:[#allocation6 + $0x100] sm:$0xff] }
  0x33   :  { %282 = vmatpush1.bf16.xpose.msra.mxu1 %v281_v26  ;;  %v87_v51 = vld [vmem:[#allocation6 + $0x138] sm:$0xff]  ;;  %v291_v54 = vpack.c.bf16 %v85_v49, %v81_v48  ;;  %v84_v57 = vld [vmem:[#allocation6 + $0x120] sm:$0xff]  ;;  %v82_v58 = vld [vmem:[#allocation6 + $0x110] sm:$0xff] }
  0x34   :  { %314 = vmatpush1.bf16.xpose.msra.mxu0 %v313_v27  ;;  %284 = vmatprep.subr.bf16.mxu1 %v283_v28  ;;  %v323_v55 = vpack.c.bf16 %v87_v51, %v83_v50  ;;  %v86_v59 = vld [vmem:[#allocation6 + $0x130] sm:$0xff]  ;;  %v89_v60 = vld [vmem:[#allocation6 + $0x148] sm:$0xff]  ;;  %v91_v62 = vld [vmem:[#allocation6 + $0x158] sm:$0xff]  ;;  %v293_v0 = vpack.c.bf16 %v84_v57, %v80_v56 }
  0x35   :  { %316 = vmatprep.subr.bf16.mxu0 %v315_v29  ;;  %v93_v61 = vld [vmem:[#allocation6 + $0x168] sm:$0xff]  ;;  %v95_v63 = vld [vmem:[#allocation6 + $0x178] sm:$0xff]  ;;  %v325_v1 = vpack.c.bf16 %v86_v59, %v82_v58  ;;  %v88_v4 = vld [vmem:[#allocation6 + $0x140] sm:$0xff] }
  0x36   :  { %v295_v2 = vpack.c.bf16 %v93_v61, %v89_v60  ;;  %v327_v3 = vpack.c.bf16 %v95_v63, %v91_v62  ;;  %v92_v5 = vld [vmem:[#allocation6 + $0x160] sm:$0xff]  ;;  %v90_v6 = vld [vmem:[#allocation6 + $0x150] sm:$0xff]  ;;  %v97_v8 = vld [vmem:[#allocation6 + $0x188] sm:$0xff] }
  0x37   :  { %v94_v7 = vld [vmem:[#allocation6 + $0x170] sm:$0xff]  ;;  %v101_v9 = vld [vmem:[#allocation6 + $0x1a8] sm:$0xff]  ;;  %v99_v10 = vld [vmem:[#allocation6 + $0x198] sm:$0xff]  ;;  %v297_v12 = vpack.c.bf16 %v92_v5, %v88_v4 }
  0x38   :  { %v103_v11 = vld [vmem:[#allocation6 + $0x1b8] sm:$0xff]  ;;  %v329_v13 = vpack.c.bf16 %v94_v7, %v90_v6  ;;  %v299_v14 = vpack.c.bf16 %v101_v9, %v97_v8  ;;  %v96_v16 = vld [vmem:[#allocation6 + $0x180] sm:$0xff]  ;;  %v98_v18 = vld [vmem:[#allocation6 + $0x190] sm:$0xff] }
  0x39   :  { %v331_v15 = vpack.c.bf16 %v103_v11, %v99_v10  ;;  %v100_v17 = vld [vmem:[#allocation6 + $0x1a0] sm:$0xff]  ;;  %v102_v19 = vld [vmem:[#allocation6 + $0x1b0] sm:$0xff]  ;;  %v105_v20 = vld [vmem:[#allocation6 + $0x1c8] sm:$0xff] }
  0x3a   :  { %v109_v21 = vld [vmem:[#allocation6 + $0x1e8] sm:$0xff]  ;;  %v107_v22 = vld [vmem:[#allocation6 + $0x1d8] sm:$0xff]  ;;  %v301_v24 = vpack.c.bf16 %v100_v17, %v96_v16  ;;  %v333_v25 = vpack.c.bf16 %v102_v19, %v98_v18  ;;  %v104_v28 = vld [vmem:[#allocation6 + $0x1c0] sm:$0xff] }
  0x3b   :  { %286 = vmatpush1.bf16.xpose.msra.mxu1 %v285_v38  ;;  %v111_v23 = vld [vmem:[#allocation6 + $0x1f8] sm:$0xff]  ;;  %v303_v26 = vpack.c.bf16 %v109_v21, %v105_v20  ;;  %v108_v29 = vld [vmem:[#allocation6 + $0x1e0] sm:$0xff]  ;;  %v106_v30 = vld [vmem:[#allocation6 + $0x1d0] sm:$0xff] }
  0x3c   :  { %318 = vmatpush1.bf16.xpose.msra.mxu0 %v317_v39  ;;  %288 = vmatprep.subr.bf16.mxu1 %v287_v40  ;;  %v335_v27 = vpack.c.bf16 %v111_v23, %v107_v22  ;;  %v110_v31 = vld [vmem:[#allocation6 + $0x1f0] sm:$0xff]  ;;  %v305_v32 = vpack.c.bf16 %v108_v29, %v104_v28  ;;  %v44_v34 = vld [vmem:[#allocation3] sm:$0xff] }
  0x3d   :  { %320 = vmatprep.subr.bf16.mxu0 %v319_v41  ;;  %v337_v33 = vpack.c.bf16 %v110_v31, %v106_v30  ;;  %v46_v35 = vld [vmem:[#allocation3 + $0x10] sm:$0xff] }
  0x43   :  { %290 = vmatpush1.bf16.xpose.msra.mxu1 %v289_v52 }
  0x44   :  { %322 = vmatpush1.bf16.xpose.msra.mxu0 %v321_v53  ;;  %292 = vmatprep.subr.bf16.mxu1 %v291_v54 }
  0x45   :  { %324 = vmatprep.subr.bf16.mxu0 %v323_v55 }
  0x4b   :  { %294 = vmatpush1.bf16.xpose.msra.mxu1 %v293_v0 }
  0x4c   :  { %326 = vmatpush1.bf16.xpose.msra.mxu0 %v325_v1  ;;  %296 = vmatprep.subr.bf16.mxu1 %v295_v2 }
  0x4d   :  { %328 = vmatprep.subr.bf16.mxu0 %v327_v3 }
  0x53   :  { %298 = vmatpush1.bf16.xpose.msra.mxu1 %v297_v12 }
  0x54   :  { %330 = vmatpush1.bf16.xpose.msra.mxu0 %v329_v13  ;;  %300 = vmatprep.subr.bf16.mxu1 %v299_v14 }
  0x55   :  { %332 = vmatprep.subr.bf16.mxu0 %v331_v15 }
  0x5b   :  { %302 = vmatpush1.bf16.xpose.msra.mxu1 %v301_v24 }
  0x5c   :  { %334 = vmatpush1.bf16.xpose.msra.mxu0 %v333_v25  ;;  %304 = vmatprep.subr.bf16.mxu1 %v303_v26 }
  0x5d   :  { %336 = vmatprep.subr.bf16.mxu0 %v335_v27 }
  0x63   :  { %306 = vmatpush1.bf16.xpose.msra.mxu1 %v305_v32 }
  0x64   :  { %338 = vmatpush1.bf16.xpose.msra.mxu0 %v337_v33 }
  0x6a   :  { %177 = vmatmul.mubr.f32.vlgmr.msra.gmra.mrb[0].mxu1 %v44_v34 }
  0x6b   :  { %247 = vmatmul.mubr.f32.vlgmr.msra.gmra.mrb[0].mxu0 %v46_v35 }
 0x13d   :  { %v178_v36 = vpop.f32.mrb[0].mxu1 }
 0x13e   :  { %v248_v37 = vpop.f32.mrb[0].mxu0  ;;  %v180_v38 = vpop.f32.mrb[1].mxu1 }
 0x13f   :  { %v249_v39 = vadd.f32 %v248_v37, %v178_v36  ;;  %v250_v40 = vpop.f32.mrb[1].mxu0 }
 0x141   :  { %258 = vst [vmem:[#allocation8] sm:$0xff] %v249_v39 }
 0x142   :  { %400 = shalt.err (!%p397_p6)
}
 0x143   :  { %s401_s10 = scalar_lea.hbm %s482_s2, 128 }
 0x144   :  { %p402_p7 = scmp.ne.s32.totalorder %s482_s2, %s401_s10  ;;  %p405_p8 = scmp.lt.u32.totalorder %s401_s10, %s482_s2 }
 0x146   :  { %p407_p9 = pnand %p405_p8, %p402_p7 }
 0x148   :  { %410 = shalt.err (!%p407_p9)
}
 0x149   :  { %268 = dma.vmem_to_hbm [thread:$0]  %s266_s6, 128, %s482_s2, [#allocation5]  }
 0x14a   :  { %415 = dma.done.wait [#allocation5], 128  }
 0x14b   :  { %416 = vsyncadd [#allocation5], 4294967168 }
 0x14c   :  { %272 = vsyncpa [#allocation4], 1 }
 0x14d   :  { %273 = vsyncpa [#allocation7], 1 }
 0x14e   :  { %274 = vsyncpa [#allocation5], 1 }

</bundles_post_ra>
